<compile_context>
chip_gen: v7x
topology: tpu7x:2x2x1
jax: 0.10.0
libtpu: 0.0.40
codegen_flags: <defaults>
</compile_context>

<pallas_src>
import jax
import jax.numpy as jnp
from jax.experimental import pallas as pl
from jax.experimental.pallas import tpu as pltpu


def _round_up(x, m):
    return (x + m - 1) // m * m


def _pick_tb(batch):
    """Batch-tile size.

    - multiple of 8 (sublane) / 16 (bf16 packing) so the block second-minor
      dim is layout-friendly,
    - capped at 1024 so double-buffered f32 x tiles (~6.3 MiB) fit v5e's
      16 MiB default scoped VMEM,
    - ~B/2 for mid-size batches so there are >= 2 grid steps for v7x's two
      TensorCores.
    """
    if batch <= 16:
        return _round_up(batch, 8)
    return min(1024, _round_up((batch + 1) // 2, 16))


def _linear_relu_logsoftmax_kernel(x_ref, w_ref, b_ref, o_ref):
    # x_ref: [TB, 784] f32   (streamed per grid step)
    # w_ref: [784, 10] bf16  (resident across grid steps)
    # b_ref: [1, 10]   f32   (resident across grid steps)
    # o_ref: [TB, 10]  f32
    x = x_ref[...].astype(jnp.bfloat16)      # in-kernel cast, feeds the MXU

    # fc1: x @ W + b  (bf16 MXU inputs, f32 accumulation)
    logits = jnp.dot(x, w_ref[...], preferred_element_type=jnp.float32)
    logits = logits + b_ref[...]

    # ReLU (f32).  Guarantees every row has a finite max >= 0, so the
    # log-softmax below never sees an all(-inf) row.
    z = jnp.maximum(logits, 0.0)

    # Numerically stable log_softmax along dim=1 (f32).
    m = jnp.max(z, axis=1, keepdims=True)
    shifted = z - m
    lse = jnp.log(jnp.sum(jnp.exp(shifted), axis=1, keepdims=True))

    o_ref[...] = (shifted - lse).astype(o_ref.dtype)


def linear_forward(x_nchw, w, b):
    """x_nchw: [B, 1, 28, 28] f32, w: [784, 10] f32, b: [10] f32
    -> [B, 10] f32 log-probabilities (Linear -> ReLU -> LogSoftmax)."""
    B = x_nchw.shape[0]
    x_flat = x_nchw.reshape(B, -1)            # x.view(x.shape[0], -1); stays f32
    in_f = x_flat.shape[1]
    out_f = w.shape[1]

    TB = _pick_tb(B)
    num_tiles = pl.cdiv(B, TB)

    # Tiny one-time casts/reshapes (resident operands only; x is untouched).
    w_bf = w.astype(jnp.bfloat16)
    b_2d = b.reshape(1, out_f).astype(jnp.float32)

    cost = pl.CostEstimate(
        flops=2 * B * in_f * out_f,
        transcendentals=B * (out_f + 1),      # exp per logit + log per row
        bytes_accessed=(x_flat.size * 4 + w_bf.size * 2 + b_2d.size * 4
                        + B * out_f * 4),
    )

    return pl.pallas_call(
        _linear_relu_logsoftmax_kernel,
        out_shape=jax.ShapeDtypeStruct((B, out_f), jnp.float32),
        grid=(num_tiles,),
        in_specs=[
            pl.BlockSpec((TB, in_f), lambda i: (i, 0)),    # x: streamed f32 tiles
            pl.BlockSpec((in_f, out_f), lambda i: (0, 0)),  # W: resident bf16
            pl.BlockSpec((1, out_f), lambda i: (0, 0)),     # bias: resident f32
        ],
        out_specs=pl.BlockSpec((TB, out_f), lambda i: (i, 0)),
        compiler_params=pltpu.CompilerParams(
            dimension_semantics=("parallel",)),
        cost_estimate=cost,
    )(x_flat, w_bf, b_2d)


if __name__ == "__main__":
    key = jax.random.PRNGKey(0)
    kx, kw, kb = jax.random.split(key, 3)

    B = 8
    x = jax.random.normal(kx, (B, 1, 28, 28), dtype=jnp.float32)

    # nn.Linear(784, 10)-style uniform(-1/sqrt(784), 1/sqrt(784)) init.
    bound = 1.0 / jnp.sqrt(784.0)
    w = jax.random.uniform(kw, (784, 10), dtype=jnp.float32,
                           minval=-bound, maxval=bound)
    b = jax.random.uniform(kb, (10,), dtype=jnp.float32,
                           minval=-bound, maxval=bound)

    out = linear_forward(x, w, b)
    out = jax.block_until_ready(out)
    assert out.shape == (B, 10)

    # Reference with the same bf16 input quantization (MXU accumulates in f32).
    x_bf = x.reshape(B, -1).astype(jnp.bfloat16).astype(jnp.float32)
    w_bf = w.astype(jnp.bfloat16).astype(jnp.float32)
    ref_bf = jax.nn.log_softmax(jnp.maximum(x_bf @ w_bf + b, 0.0), axis=1)
    assert jnp.allclose(out, ref_bf, atol=1e-3, rtol=1e-3)

    # Loose semantic check against the full-f32 PyTorch-equivalent forward.
    # (bf16 quantization of x/W is a deliberate precision trade.)
    ref_f32 = jax.nn.log_softmax(
        jnp.maximum(x.reshape(B, -1) @ w + b, 0.0), axis=1)
    assert jnp.allclose(out, ref_f32, atol=2e-2, rtol=2e-2)

    print("KERNEL_OK")
</pallas_src>

<mosaic_0001>
module attributes {stable_mosaic.version = 11 : i64} {
  func.func @_linear_relu_logsoftmax_kernel(%arg0: i32, %arg1: memref<8x784xf32, #tpu.memory_space<vmem>>, %arg2: memref<784x10xbf16, #tpu.memory_space<vmem>>, %arg3: memref<1x10xf32, #tpu.memory_space<vmem>>, %arg4: memref<8x10xf32, #tpu.memory_space<vmem>>) attributes {dimension_semantics = [#tpu.dimension_semantics<parallel>], iteration_bounds = array<i64: 1>, scalar_prefetch = 0 : i64, scratch_operands = 0 : i64, tpu.core_type = #tpu.core_type<tc>, window_params = [{transform_indices = @transform_0, window_bounds = array<i64: 8, 784>}, {pipeline_mode = #tpu.pipeline_mode<synchronous>, transform_indices = @transform_1, window_bounds = array<i64: 784, 10>}, {pipeline_mode = #tpu.pipeline_mode<synchronous>, transform_indices = @transform_2, window_bounds = array<i64: 1, 10>}, {transform_indices = @transform_3, window_bounds = array<i64: 8, 10>}]} {
    %c0 = arith.constant 0 : index
    %c0_0 = arith.constant 0 : index
    %0 = vector.load %arg1[%c0, %c0_0] : memref<8x784xf32, #tpu.memory_space<vmem>>, vector<8x784xf32>
    %1 = arith.truncf %0 : vector<8x784xf32> to vector<8x784xbf16>
    %c0_1 = arith.constant 0 : index
    %c0_2 = arith.constant 0 : index
    %2 = vector.load %arg2[%c0_1, %c0_2] : memref<784x10xbf16, #tpu.memory_space<vmem>>, vector<784x10xbf16>
    %cst = arith.constant dense<0.000000e+00> : vector<8x10xf32>
    %3 = tpu.matmul %1, %2, %cst {dimension_numbers = #tpu.dot_dimension_numbers<[1], [0], [0], [1], [0, 0, 1, 1], [], []>} : vector<8x784xbf16>, vector<784x10xbf16>, vector<8x10xf32> -> vector<8x10xf32>
    %c0_3 = arith.constant 0 : index
    %c0_4 = arith.constant 0 : index
    %4 = vector.load %arg3[%c0_3, %c0_4] : memref<1x10xf32, #tpu.memory_space<vmem>>, vector<1x10xf32>
    %5 = vector.broadcast %4 : vector<1x10xf32> to vector<8x10xf32>
    %6 = arith.addf %3, %5 : vector<8x10xf32>
    %cst_5 = arith.constant 0.000000e+00 : f32
    %7 = vector.broadcast %cst_5 : f32 to vector<8x10xf32>
    %8 = arith.maximumf %6, %7 : vector<8x10xf32>
    %cst_6 = arith.constant dense<0xFF800000> : vector<8xf32>
    %9 = vector.multi_reduction <maximumf>, %8, %cst_6 [1] : vector<8x10xf32> to vector<8xf32>
    %10 = vector.shape_cast %9 : vector<8xf32> to vector<8x1xf32>
    %11 = vector.broadcast %10 : vector<8x1xf32> to vector<8x10xf32>
    %12 = arith.subf %8, %11 : vector<8x10xf32>
    %13 = math.exp %12 : vector<8x10xf32>
    %cst_7 = arith.constant dense<0.000000e+00> : vector<8xf32>
    %14 = vector.multi_reduction <add>, %13, %cst_7 [1] : vector<8x10xf32> to vector<8xf32>
    %15 = vector.shape_cast %14 : vector<8xf32> to vector<8x1xf32>
    %16 = math.log %15 : vector<8x1xf32>
    %17 = vector.broadcast %16 : vector<8x1xf32> to vector<8x10xf32>
    %18 = arith.subf %12, %17 : vector<8x10xf32>
    %c0_8 = arith.constant 0 : index
    %c0_9 = arith.constant 0 : index
    %19 = vector.load %arg4[%c0_8, %c0_9] : memref<8x10xf32, #tpu.memory_space<vmem>>, vector<8x10xf32>
    tpu.vector_store %arg4[%c0_8, %c0_9], %18 {strides = array<i32>} : memref<8x10xf32, #tpu.memory_space<vmem>>, vector<8x10xf32>,
    return
  }
  func.func @transform_0(%arg0: i32) -> (i32, i32) {
    %c0_i32 = arith.constant 0 : i32
    %c0_i32_0 = arith.constant 0 : i32
    return %arg0, %c0_i32 : i32, i32
  }
  func.func @transform_1(%arg0: i32) -> (i32, i32) {
    %c0_i32 = arith.constant 0 : i32
    %c0_i32_0 = arith.constant 0 : i32
    %c0_i32_1 = arith.constant 0 : i32
    return %c0_i32, %c0_i32_0 : i32, i32
  }
  func.func @transform_2(%arg0: i32) -> (i32, i32) {
    %c0_i32 = arith.constant 0 : i32
    %c0_i32_0 = arith.constant 0 : i32
    %c0_i32_1 = arith.constant 0 : i32
    return %c0_i32, %c0_i32_0 : i32, i32
  }
  func.func @transform_3(%arg0: i32) -> (i32, i32) {
    %c0_i32 = arith.constant 0 : i32
    %c0_i32_0 = arith.constant 0 : i32
    return %arg0, %c0_i32 : i32, i32
  }
}

</mosaic_0001>

<bundles_post_ra>
// kernel: tpu_custom_call.1
= control target key start
LH: loop header
LB: loop body
LE: loop exit
PB: predicated region body
PF: predicated region fallthrough
CT: control target
= control target key end

     0   :  { %v827_v44 = vmov 0.0   ;;  %vm828_vm0 = vmmov 0   ;;  %s1036_s0 = inlined_call_operand.vmem [shape: f32[8,784], index: 0, kind: input, shape index: {}]   ;;  %s1037_s1 = inlined_call_operand.vmem [shape: bf16[784,10], index: 1, kind: input, shape index: {}]   ;;  %s1038_s2 = inlined_call_operand.vmem [shape: f32[1,10], index: 2, kind: input, shape index: {}]   ;;  %s1039_s3 = inlined_call_operand.hbm [shape: f32[8,10], index: 3, kind: output, shape index: {}]  }
   0x1   :  { %v750_v0 = vld [vmem:[%s1037_s1 + $0x40] sm:$0xff]   ;;  %v754_v4 = vld [vmem:[%s1037_s1 + $0x48] sm:$0xff]   ;;  %v758_v8 = vld [vmem:[%s1037_s1 + $0x50] sm:$0xff]  }
   0x2   :  { %v751_v1 = vld [vmem:[%s1037_s1] sm:$0xff]   ;;  %673 = vmatprep.subr.bf16.mxu0 %v750_v0  ;;  %v755_v5 = vld [vmem:[%s1037_s1 + $0x8] sm:$0xff]   ;;  %v759_v9 = vld [vmem:[%s1037_s1 + $0x10] sm:$0xff]  }
   0x3   :  { %v752_v2 = vld [vmem:[%s1037_s1 + $0xc0] sm:$0xff]   ;;  %674 = vmatpush3.bf16.msra.mxu0 %v751_v1  ;;  %v756_v6 = vld [vmem:[%s1037_s1 + $0xc8] sm:$0xff]   ;;  %v760_v10 = vld [vmem:[%s1037_s1 + $0xd0] sm:$0xff]  }
   0x4   :  { %v753_v3 = vld [vmem:[%s1037_s1 + $0x80] sm:$0xff]   ;;  %695 = vmatprep.subr.bf16.mxu1 %v752_v2  ;;  %675 = vmatprep.subr.bf16.mxu0 %v754_v4  ;;  %v757_v7 = vld [vmem:[%s1037_s1 + $0x88] sm:$0xff]   ;;  %v761_v11 = vld [vmem:[%s1037_s1 + $0x90] sm:$0xff]  }
   0x5   :  { %696 = vmatpush3.bf16.msra.mxu1 %v753_v3  ;;  %v762_v12 = vld [vmem:[%s1037_s1 + $0x58] sm:$0xff]   ;;  %v766_v16 = vld [vmem:[%s1037_s1 + $0x60] sm:$0xff]   ;;  %v770_v20 = vld [vmem:[%s1037_s1 + $0x68] sm:$0xff]  }
   0x6   :  { %697 = vmatprep.subr.bf16.mxu1 %v756_v6  ;;  %v763_v13 = vld [vmem:[%s1037_s1 + $0x18] sm:$0xff]   ;;  %v767_v17 = vld [vmem:[%s1037_s1 + $0x20] sm:$0xff]   ;;  %v771_v21 = vld [vmem:[%s1037_s1 + $0x28] sm:$0xff]  }
   0x7   :  { %676 = vmatpush3.bf16.msra.mxu0 %v755_v5  ;;  %v764_v14 = vld [vmem:[%s1037_s1 + $0xd8] sm:$0xff]   ;;  %v768_v18 = vld [vmem:[%s1037_s1 + $0xe0] sm:$0xff]   ;;  %v772_v22 = vld [vmem:[%s1037_s1 + $0xe8] sm:$0xff]  }
   0x8   :  { %677 = vmatprep.subr.bf16.mxu0 %v758_v8  ;;  %v765_v15 = vld [vmem:[%s1037_s1 + $0x98] sm:$0xff]   ;;  %v769_v19 = vld [vmem:[%s1037_s1 + $0xa0] sm:$0xff]   ;;  %v773_v23 = vld [vmem:[%s1037_s1 + $0xa8] sm:$0xff]  }
   0x9   :  { %698 = vmatpush3.bf16.msra.mxu1 %v757_v7  ;;  %v774_v24 = vld [vmem:[%s1037_s1 + $0x70] sm:$0xff]   ;;  %v778_v28 = vld [vmem:[%s1037_s1 + $0x78] sm:$0xff]   ;;  %v17_v31 = vld [vmem:[%s1036_s0 + $0x8] sm:$0xff] }
   0xa   :  { %699 = vmatprep.subr.bf16.mxu1 %v760_v10  ;;  %v775_v25 = vld [vmem:[%s1037_s1 + $0x30] sm:$0xff]   ;;  %v779_v29 = vld [vmem:[%s1037_s1 + $0x38] sm:$0xff]   ;;  %v24_v32 = vpack.c.bf16 %v17_v31, %v17_v31  ;;  %v16_v34 = vld [vmem:[%s1036_s0] sm:$0xff] }
   0xb   :  { %678 = vmatpush3.bf16.msra.mxu0 %v759_v9  ;;  %v776_v26 = vld [vmem:[%s1037_s1 + $0xf0] sm:$0xff]   ;;  %v780_v30 = vld [vmem:[%s1037_s1 + $0xf8] sm:$0xff]   ;;  %v23_v35 = vpack.c.bf16 %v16_v34, %v16_v34  ;;  %v782_v36 = vld [vmem:[%s1037_s1 + $0x140] sm:$0xff]  }
   0xc   :  { %679 = vmatprep.subr.bf16.mxu0 %v762_v12  ;;  %v777_v27 = vld [vmem:[%s1037_s1 + $0xb0] sm:$0xff]   ;;  %v781_v33 = vld [vmem:[%s1037_s1 + $0xb8] sm:$0xff]   ;;  %465 = vmatprep.mubr.bf16.mxu0 %v24_v32  ;;  %v783_v39 = vld [vmem:[%s1037_s1 + $0x100] sm:$0xff]  }
   0xd   :  { %700 = vmatpush3.bf16.msra.mxu1 %v761_v11  ;;  %v19_v37 = vld [vmem:[%s1036_s0 + $0x18] sm:$0xff]  ;;  %v18_v40 = vld [vmem:[%s1036_s0 + $0x10] sm:$0xff]  ;;  %v784_v42 = vld [vmem:[%s1037_s1 + $0x148] sm:$0xff]  }
   0xe   :  { %701 = vmatprep.subr.bf16.mxu1 %v764_v14  ;;  %v26_v38 = vpack.c.bf16 %v19_v37, %v19_v37  ;;  %v25_v41 = vpack.c.bf16 %v18_v40, %v18_v40  ;;  %v785_v43 = vld [vmem:[%s1037_s1 + $0x108] sm:$0xff]   ;;  %v786_v45 = vld [vmem:[%s1037_s1 + $0x150] sm:$0xff]   ;;  %v788_v47 = vld [vmem:[%s1037_s1 + $0x158] sm:$0xff]  }
   0xf   :  { %680 = vmatpush3.bf16.msra.mxu0 %v763_v13  ;;  %v787_v46 = vld [vmem:[%s1037_s1 + $0x110] sm:$0xff]   ;;  %v789_v48 = vld [vmem:[%s1037_s1 + $0x118] sm:$0xff]   ;;  %v790_v49 = vld [vmem:[%s1037_s1 + $0x160] sm:$0xff]  }
  0x10   :  { %681 = vmatprep.subr.bf16.mxu0 %v766_v16  ;;  %505 = vmatprep.mubr.bf16.mxu1 %v26_v38  ;;  %v791_v50 = vld [vmem:[%s1037_s1 + $0x120] sm:$0xff]   ;;  %v792_v51 = vld [vmem:[%s1037_s1 + $0x168] sm:$0xff]   ;;  %v22_v55 = vld [vmem:[%s1036_s0 + $0x30] sm:$0xff] }
  0x11   :  { %702 = vmatpush3.bf16.msra.mxu1 %v765_v15  ;;  %v798_v52 = vld [vmem:[%s1037_s1 + $0x180] sm:$0xff]   ;;  %v21_v53 = vld [vmem:[%s1036_s0 + $0x28] sm:$0xff] }
  0x12   :  { %703 = vmatprep.subr.bf16.mxu1 %v768_v18  ;;  %v28_v54 = vpack.c.bf16 %v21_v53, %v21_v53 }
  0x13   :  { %682 = vmatpush3.bf16.msra.mxu0 %v767_v17 }
  0x14   :  { %683 = vmatprep.subr.bf16.mxu0 %v770_v20 }
  0x15   :  { %704 = vmatpush3.bf16.msra.mxu1 %v769_v19 }
  0x16   :  { %705 = vmatprep.subr.bf16.mxu1 %v772_v22 }
  0x17   :  { %684 = vmatpush3.bf16.msra.mxu0 %v771_v21 }
  0x18   :  { %685 = vmatprep.subr.bf16.mxu0 %v774_v24 }
  0x19   :  { %706 = vmatpush3.bf16.msra.mxu1 %v773_v23 }
  0x1a   :  { %707 = vmatprep.subr.bf16.mxu1 %v776_v26 }
  0x1b   :  { %686 = vmatpush3.bf16.msra.mxu0 %v775_v25 }
  0x1c   :  { %687 = vmatprep.subr.bf16.mxu0 %v778_v28 }
  0x1d   :  { %708 = vmatpush3.bf16.msra.mxu1 %v777_v27 }
  0x1e   :  { %709 = vmatprep.subr.bf16.mxu1 %v780_v30 }
  0x1f   :  { %688 = vmatpush3.bf16.msra.mxu0 %v779_v29 }
  0x20   :  { %717 = vmatprep.subr.bf16.mxu0 %v782_v36 }
  0x21   :  { %710 = vmatpush3.bf16.msra.mxu1 %v781_v33 }
  0x22   :  { %466 = vmatmul.mubr.bf16.vlgmr.msra.gmra.mrb[0].mxu0 %v23_v35  ;;  %741 = vmatprep.subr.bf16.mxu1 %v827_v44 }
  0x23   :  { %718 = vmatpush3.bf16.msra.mxu0 %v783_v39 }
  0x24   :  { %506 = vmatmul.mubr.bf16.vlgmr.msra.gmra.mrb[0].mxu1 %v25_v41  ;;  %719 = vmatprep.subr.bf16.mxu0 %v784_v42 }
  0x25   :  { %743 = vmatprep.mubr.msk.bf16.mxu1 %vm828_vm0, %v827_v44 }
  0x27   :  { %720 = vmatpush3.bf16.msra.mxu0 %v785_v43 }
  0x28   :  { %721 = vmatprep.subr.bf16.mxu0 %v786_v45 }
  0x2b   :  { %722 = vmatpush3.bf16.msra.mxu0 %v787_v46 }
  0x2c   :  { %723 = vmatprep.subr.bf16.mxu0 %v788_v47 }
  0x2f   :  { %724 = vmatpush3.bf16.msra.mxu0 %v789_v48 }
  0x30   :  { %725 = vmatprep.subr.bf16.mxu0 %v790_v49 }
  0x31   :  { %8 = vsyncpa [#allocation3], 0  ;;  %v793_v56 = vld [vmem:[%s1037_s1 + $0x128] sm:$0xff]   ;;  %742 = vmatpush3.bf16.msra.mxu1 %v798_v52  ;;  %v29_v57 = vpack.c.bf16 %v22_v55, %v22_v55  ;;  %vm429_vm1 = vcmask 130048   ;;  %v794_v58 = vld [vmem:[%s1037_s1 + $0x170] sm:$0xff]   ;;  %545 = vmatprep.mubr.bf16.mxu0 %v28_v54  ;;  %vm594_vm2 = vcmask 80896  }
  0x32   :  { %v795_v59 = vld [vmem:[%s1037_s1 + $0x130] sm:$0xff]   ;;  %v796_v60 = vld [vmem:[%s1037_s1 + $0x178] sm:$0xff]   ;;  %v20_v62 = vld [vmem:[%s1036_s0 + $0x20] sm:$0xff]  ;;  %s829_s0 = smov [#allocation2]  }
  0x33   :  { %726 = vmatpush3.bf16.msra.mxu0 %v791_v50  ;;  %v797_v61 = vld [vmem:[%s1037_s1 + $0x138] sm:$0xff]   ;;  %v27_v63 = vpack.c.bf16 %v20_v62, %v20_v62  ;;  %v622_v1 = vld [vmem:[%s1038_s2] ss:$0 sm:$0xff]  ;;  %s614_s1 = sshll.u32 %s829_s0, 4  ;;  %s615_s1 = int_to_ptr.vmem [resolvable:$true] %s614_s1 }
  0x34   :  { %727 = vmatprep.subr.bf16.mxu0 %v792_v51  ;;  %744 = vmatmul.mubr.msk.bf16.vlgmr.msra.gmra.mrb[4].mxu1 %vm429_vm1, %v29_v57  ;;  %s803_s2 = scalar_lea.vmem %s615_s1, 128  ;;  %p808_p1 = scmp.lt.s32.totalorder %s615_s1, %s615_s1 }
  0x35   :  { %p804_p0 = scmp.ne.s32.totalorder %s615_s1, %s803_s2  ;;  %p809_p2 = scmp.lt.s32.totalorder %s803_s2, %s803_s2 }
  0x37   :  { %728 = vmatpush3.bf16.msra.mxu0 %v793_v56  ;;  %p810_p3 = por %p809_p2, %p808_p1 }
  0x38   :  { %729 = vmatprep.subr.bf16.mxu0 %v794_v58 }
  0x39   :  { %p811_p4 = pnand %p810_p3, %p804_p0 }
  0x3b   :  { %730 = vmatpush3.bf16.msra.mxu0 %v795_v59 }
  0x3c   :  { %731 = vmatprep.subr.bf16.mxu0 %v796_v60 }
  0x3f   :  { %732 = vmatpush3.bf16.msra.mxu0 %v797_v61 }
  0x42   :  { %546 = vmatmul.mubr.bf16.vlgmr.msra.gmra.mrb[4].mxu0 %v27_v63 }
  0xf5   :  { %v689_v0 = vpop.f32.mrb[0].mxu0 }
  0xf6   :  { %v690_v2 = vpop.f32.mrb[1].mxu0 }
  0xf7   :  { %v691_v3 = vadd.f32 %v690_v2, %v689_v0  ;;  %v692_v4 = vpop.f32.mrb[2].mxu0  ;;  %v711_v5 = vpop.f32.mrb[0].mxu1 }
  0xf8   :  { %v693_v6 = vpop.f32.mrb[3].mxu0  ;;  %v712_v8 = vpop.f32.mrb[1].mxu1 }
  0xf9   :  { %v468_v7 = vadd.f32 %v691_v3, %v622_v1  ;;  %v713_v9 = vadd.f32 %v712_v8, %v711_v5  ;;  %v714_v10 = vpop.f32.mrb[2].mxu1 }
  0xfa   :  { %v715_v11 = vpop.f32.mrb[3].mxu1 }
  0xfb   :  { %v508_v12 = vadd.f32 %v713_v9, %v468_v7 }
 0x107   :  { %v587_v13 = vpop.f32.mrb[4].mxu1 }
 0x108   :  { %v745_v14 = vpop.f32.mrb[5].mxu1 }
 0x109   :  { %v590_v15 = vpop.f32.mrb[6].mxu1 }
 0x10a   :  { %v746_v16 = vpop.f32.mrb[7].mxu1 }
 0x115   :  { %v733_v17 = vpop.f32.mrb[4].mxu0 }
 0x116   :  { %v734_v18 = vpop.f32.mrb[5].mxu0 }
 0x117   :  { %v735_v19 = vadd.f32 %v734_v18, %v733_v17  ;;  %v736_v20 = vpop.f32.mrb[6].mxu0 }
 0x118   :  { %v737_v21 = vpop.f32.mrb[7].mxu0 }
 0x119   :  { %v548_v22 = vadd.f32 %v735_v19, %v508_v12 }
 0x11b   :  { %v588_v23 = vadd.f32 %v587_v13, %v548_v22 }
 0x11d   :  { %v593_v24 = vmax.f32 %v588_v23, 0.0 }
 0x11f   :  { %v595_v25 = vsel %vm594_vm2, %v593_v24, -inf }
 0x120   :  { %596 = vmax.xlane.f32.xlu0 %v595_v25 }
 0x1ad   :  { %v597_v26 = vpop.xlane.xlu0 %596 }
 0x1ae   :  { %v598_v27 = vsub.f32 %v593_v24, %v597_v26 }
 0x1b0   :  { %v599_v28 = vmul.f32 1.442695, %v598_v27 }
 0x1b2   :  { %799 = vpow2.f32 %v599_v28 }
 0x1bc   :  { %v800_v29 = vpop.eup %799 }
 0x1bd   :  { %v601_v30 = vsel %vm594_vm2, %v800_v29, 0.0 }
 0x1be   :  { %602 = vadd.xlane.f32.xlu0 %v601_v30 }
 0x24b   :  { %v603_v31 = vpop.xlane.xlu0 %602 }
 0x24c   :  { %801 = vlog2.f32 %v603_v31 }
 0x256   :  { %v802_v32 = vpop.eup %801 }
 0x257   :  { %v605_v33 = vmul.f32 0.6931472, %v802_v32 }
 0x259   :  { %v606_v34 = vsub.f32 %v598_v27, %v605_v33 }
 0x25b   :  { %607 = vst.msk [vmem:[#allocation2] sm:$0xff] %vm594_vm2, %v606_v34 }
 0x25c   :  { %814 = shalt.err (!%p811_p4)
}
 0x25d   :  { %s815_s20 = scalar_lea.hbm %s1039_s3, 128 }
 0x25e   :  { %p816_p5 = scmp.ne.s32.totalorder %s1039_s3, %s815_s20  ;;  %p819_p6 = scmp.lt.u32.totalorder %s815_s20, %s1039_s3 }
 0x260   :  { %p821_p7 = pnand %p819_p6, %p816_p5 }
 0x262   :  { %824 = shalt.err (!%p821_p7)
}
 0x263   :  { %617 = dma.vmem_to_hbm [thread:$0]  %s615_s1, 128, %s1039_s3, [#allocation3]  }
 0x264   :  { %825 = dma.done.wait [#allocation3], 128  }
 0x265   :  { %826 = vsyncadd [#allocation3], 4294967168 }
 0x266   :  { %621 = vsyncpa [#allocation3], 1 }

</bundles_post_ra>
